<compile_context>
chip_gen: v7x
topology: tpu7x:2x2x1
jax: 0.10.0
libtpu: 0.0.40
codegen_flags: <defaults>
</compile_context>

<pallas_src>
import functools

import jax
import jax.numpy as jnp
from jax import lax
from jax.experimental import pallas as pl
from jax.experimental.pallas import tpu as pltpu


def _unrolled_pow(q, gamma):
    """q ** gamma.  For non-negative integer gamma: unrolled square-and-multiply
    (VPU-only, no EUP transcendentals, no log-of-negative NaN edge case)."""
    if float(gamma) == int(gamma) and gamma >= 0:
        k = int(gamma)
        if k == 0:
            return jnp.ones_like(q)
        result = None
        base = q
        while k > 0:
            if k & 1:
                result = base if result is None else result * base
            k >>= 1
            if k:
                base = base * base
        return result
    # Non-integer gamma: clamp so rounding (p_t marginally > 1) can't feed log a negative.
    return jnp.maximum(q, 0.0) ** gamma


def _focal_loss_kernel(x_ref, t_ref, partial_ref, *, gamma, tile_n, n_valid):
    # x_ref: (tile_n, C) logits | t_ref: (tile_n, 1) int32 | partial_ref: (1, 8, 128) f32
    pid = pl.program_id(0)

    x = x_ref[...].astype(jnp.float32)                           # (tile_n, C)

    # log-softmax pieces (the exp for the lse is the only full-tile transcendental)
    m = jnp.max(x, axis=-1, keepdims=True)                       # (tile_n, 1)
    z = x - m
    lse = jnp.log(jnp.sum(jnp.exp(z), axis=-1, keepdims=True))   # (tile_n, 1)

    # Gather the target column first (one-hot dot), then do focal math on (tile_n, 1).
    col_ids = lax.broadcasted_iota(jnp.int32, z.shape, 1)        # (tile_n, C)
    onehot = (col_ids == t_ref[...]).astype(jnp.float32)         # (tile_n, C)
    z_t = jnp.sum(z * onehot, axis=-1, keepdims=True)            # (tile_n, 1)

    logp_t = z_t - lse                                           # (tile_n, 1)
    p_t = jnp.exp(logp_t)                                        # only tile_n exps
    mod = _unrolled_pow(1.0 - p_t, gamma)                        # VPU-only for int gamma
    per_sample = -(mod * logp_t)                                 # (tile_n, 1)

    # Mask rows that are pure padding (batch may not be a multiple of tile_n).
    row_ids = pid * tile_n + lax.broadcasted_iota(jnp.int32, (tile_n, 1), 0)
    per_sample = jnp.where(row_ids < n_valid, per_sample, 0.0)

    block_sum = jnp.sum(per_sample)
    # Lane-dense (8, 128) block per tile: unmasked full-width vector stores.
    partial_ref[...] = jnp.full(partial_ref.shape, block_sum, dtype=jnp.float32)


def _pick_tile_n(n_pad8, c, itemsize):
    # Aim for ~4 MiB per logits block (8 MiB double-buffered) -- comfortably inside
    # the scoped-VMEM defaults on every generation (16 MiB v5e, 32 MiB v6e/v7x) while
    # keeping per-grid-step overhead amortized.
    target_bytes = 4 * 1024 * 1024
    rows = target_bytes // max(1, c * itemsize)
    rows = min(rows, n_pad8, 4096)
    rows = max(8, (rows // 8) * 8)
    return rows


def focal_loss(input_tensor: jax.Array, target_tensor: jax.Array,
               gamma: float = 5.0) -> jax.Array:
    """Pallas TPU implementation of FocalLoss.forward (weight=None)."""
    n, c = input_tensor.shape
    itemsize = jnp.dtype(input_tensor.dtype).itemsize

    n_pad8 = ((n + 7) // 8) * 8
    tile_n = _pick_tile_n(n_pad8, c, itemsize)
    num_tiles = (n + tile_n - 1) // tile_n
    n_pad = num_tiles * tile_n

    x = input_tensor
    t = target_tensor.reshape(n).astype(jnp.int32)
    if n_pad != n:
        x = jnp.pad(x, ((0, n_pad - n), (0, 0)))
        t = jnp.pad(t, (0, n_pad - n))
    t2d = t.reshape(n_pad, 1)

    kernel = functools.partial(_focal_loss_kernel, gamma=gamma,
                               tile_n=tile_n, n_valid=n)

    cost = pl.CostEstimate(
        flops=6 * n_pad * c,
        transcendentals=n_pad * c + 2 * n_pad,
        bytes_accessed=n_pad * c * itemsize + n_pad * 4 + num_tiles * 8 * 128 * 4,
    )

    partials = pl.pallas_call(
        kernel,
        out_shape=jax.ShapeDtypeStruct((num_tiles, 8, 128), jnp.float32),
        grid=(num_tiles,),
        in_specs=[
            pl.BlockSpec((tile_n, c), lambda i: (i, 0)),   # logits block
            pl.BlockSpec((tile_n, 1), lambda i: (i, 0)),   # targets block
        ],
        out_specs=pl.BlockSpec((1, 8, 128), lambda i: (i, 0, 0)),
        compiler_params=pltpu.CompilerParams(
            dimension_semantics=("parallel",),
        ),
        cost_estimate=cost,
    )(x, t2d)

    # Tiny final reduction: one value per tile (replicated across the lane-dense block).
    return jnp.sum(partials[:, 0, 0]) / jnp.float32(n)


def focal_loss_ref(input_tensor, target_tensor, gamma=5.0):
    # pure-JAX reference mirroring the PyTorch forward
    log_prob = jax.nn.log_softmax(input_tensor.astype(jnp.float32), axis=-1)
    prob = jnp.exp(log_prob)
    modulated = ((1.0 - prob) ** gamma) * log_prob
    picked = jnp.take_along_axis(modulated, target_tensor[:, None], axis=-1)[:, 0]
    return jnp.mean(-picked)


if __name__ == "__main__":
    key = jax.random.PRNGKey(0)

    # Case 1: small shape consistent with the module (batch=8, classes=32).
    k_x, k_t, k_x2, k_t2 = jax.random.split(key, 4)
    N, C = 8, 32
    x = jax.random.normal(k_x, (N, C), dtype=jnp.float32)
    t = jax.random.randint(k_t, (N,), minval=0, maxval=C, dtype=jnp.int32)

    loss = focal_loss(x, t, gamma=5.0)
    jax.block_until_ready(loss)
    ref = focal_loss_ref(x, t, gamma=5.0)
    assert jnp.allclose(loss, ref, rtol=1e-5, atol=1e-6), (loss, ref)

    # Case 2: batch not a multiple of the tile (exercises padding/masking path).
    N2, C2 = 13, 40
    x2 = jax.random.normal(k_x2, (N2, C2), dtype=jnp.float32)
    t2 = jax.random.randint(k_t2, (N2,), minval=0, maxval=C2, dtype=jnp.int32)

    loss2 = focal_loss(x2, t2, gamma=5.0)
    jax.block_until_ready(loss2)
    ref2 = focal_loss_ref(x2, t2, gamma=5.0)
    assert jnp.allclose(loss2, ref2, rtol=1e-5, atol=1e-6), (loss2, ref2)

    print("KERNEL_OK")
</pallas_src>

<mosaic_0001>
module attributes {stable_mosaic.version = 11 : i64} {
  func.func @_focal_loss_kernel(%arg0: i32, %arg1: memref<8x32xf32, #tpu.memory_space<vmem>>, %arg2: memref<8x1xi32, #tpu.memory_space<vmem>>, %arg3: memref<1x8x128xf32, #tpu.memory_space<vmem>>) attributes {dimension_semantics = [#tpu.dimension_semantics<parallel>], iteration_bounds = array<i64: 1>, scalar_prefetch = 0 : i64, scratch_operands = 0 : i64, tpu.core_type = #tpu.core_type<tc>, window_params = [{transform_indices = @transform_0, window_bounds = array<i64: 8, 32>}, {transform_indices = @transform_1, window_bounds = array<i64: 8, 1>}, {transform_indices = @transform_2, window_bounds = array<i64: 1, 8, 128>}]} {
    %c0 = arith.constant 0 : index
    %c0_0 = arith.constant 0 : index
    %0 = vector.load %arg1[%c0, %c0_0] : memref<8x32xf32, #tpu.memory_space<vmem>>, vector<8x32xf32>
    %cst = arith.constant dense<0xFF800000> : vector<8xf32>
    %1 = vector.multi_reduction <maximumf>, %0, %cst [1] : vector<8x32xf32> to vector<8xf32>
    %2 = vector.shape_cast %1 : vector<8xf32> to vector<8x1xf32>
    %3 = vector.broadcast %2 : vector<8x1xf32> to vector<8x32xf32>
    %4 = arith.subf %0, %3 : vector<8x32xf32>
    %5 = math.exp %4 : vector<8x32xf32>
    %cst_1 = arith.constant dense<0.000000e+00> : vector<8xf32>
    %6 = vector.multi_reduction <add>, %5, %cst_1 [1] : vector<8x32xf32> to vector<8xf32>
    %7 = vector.shape_cast %6 : vector<8xf32> to vector<8x1xf32>
    %8 = math.log %7 : vector<8x1xf32>
    %9 = tpu.iota {dimensions = array<i32: 1>} : vector<8x32xi32>
    %c0_2 = arith.constant 0 : index
    %c0_3 = arith.constant 0 : index
    %10 = vector.load %arg2[%c0_2, %c0_3] : memref<8x1xi32, #tpu.memory_space<vmem>>, vector<8x1xi32>
    %11 = vector.broadcast %10 : vector<8x1xi32> to vector<8x32xi32>
    %12 = arith.cmpi eq, %9, %11 : vector<8x32xi32>
    %13 = arith.extui %12 : vector<8x32xi1> to vector<8x32xi32>
    %14 = arith.sitofp %13 : vector<8x32xi32> to vector<8x32xf32>
    %15 = arith.mulf %4, %14 : vector<8x32xf32>
    %cst_4 = arith.constant dense<0.000000e+00> : vector<8xf32>
    %16 = vector.multi_reduction <add>, %15, %cst_4 [1] : vector<8x32xf32> to vector<8xf32>
    %17 = vector.shape_cast %16 : vector<8xf32> to vector<8x1xf32>
    %18 = arith.subf %17, %8 : vector<8x1xf32>
    %19 = math.exp %18 : vector<8x1xf32>
    %cst_5 = arith.constant 1.000000e+00 : f32
    %20 = vector.broadcast %cst_5 : f32 to vector<8x1xf32>
    %21 = arith.subf %20, %19 : vector<8x1xf32>
    %22 = arith.mulf %21, %21 : vector<8x1xf32>
    %23 = arith.mulf %22, %22 : vector<8x1xf32>
    %24 = arith.mulf %21, %23 : vector<8x1xf32>
    %25 = arith.mulf %24, %18 : vector<8x1xf32>
    %cst_6 = arith.constant 0.000000e+00 : f32
    %26 = vector.broadcast %cst_6 : f32 to vector<8x1xf32>
    %27 = arith.subf %26, %25 : vector<8x1xf32>
    %c8_i32 = arith.constant 8 : i32
    %28 = arith.muli %arg0, %c8_i32 : i32
    %29 = tpu.iota {dimensions = array<i32: 0>} : vector<8x1xi32>
    %30 = vector.broadcast %28 : i32 to vector<8x1xi32>
    %31 = arith.addi %30, %29 : vector<8x1xi32>
    %c8_i32_7 = arith.constant 8 : i32
    %32 = vector.broadcast %c8_i32_7 : i32 to vector<8x1xi32>
    %33 = arith.cmpi slt, %31, %32 : vector<8x1xi32>
    %cst_8 = arith.constant 0.000000e+00 : f32
    %34 = vector.broadcast %cst_8 : f32 to vector<8x1xf32>
    %35 = arith.select %33, %27, %34 : vector<8x1xi1>, vector<8x1xf32>
    %36 = vector.shape_cast %35 : vector<8x1xf32> to vector<1x8x1xf32>
    %cst_9 = arith.constant dense<0.000000e+00> : vector<1xf32>
    %37 = vector.multi_reduction <add>, %36, %cst_9 [1, 2] : vector<1x8x1xf32> to vector<1xf32>
    %38 = vector.shape_cast %37 : vector<1xf32> to vector<1x1x1xf32>
    %39 = vector.extract %38[0, 0, 0] : f32 from vector<1x1x1xf32>
    %40 = vector.broadcast %39 : f32 to vector<1x8x128xf32>
    %c0_10 = arith.constant 0 : index
    %c0_11 = arith.constant 0 : index
    %c0_12 = arith.constant 0 : index
    %41 = vector.load %arg3[%c0_10, %c0_11, %c0_12] : memref<1x8x128xf32, #tpu.memory_space<vmem>>, vector<1x8x128xf32>
    tpu.vector_store %arg3[%c0_10, %c0_11, %c0_12], %40 {strides = array<i32>} : memref<1x8x128xf32, #tpu.memory_space<vmem>>, vector<1x8x128xf32>,
    return
  }
  func.func @transform_0(%arg0: i32) -> (i32, i32) {
    %c0_i32 = arith.constant 0 : i32
    %c0_i32_0 = arith.constant 0 : i32
    return %arg0, %c0_i32 : i32, i32
  }
  func.func @transform_1(%arg0: i32) -> (i32, i32) {
    %c0_i32 = arith.constant 0 : i32
    %c0_i32_0 = arith.constant 0 : i32
    return %arg0, %c0_i32 : i32, i32
  }
  func.func @transform_2(%arg0: i32) -> (i32, i32, i32) {
    %c0_i32 = arith.constant 0 : i32
    %c0_i32_0 = arith.constant 0 : i32
    %c0_i32_1 = arith.constant 0 : i32
    return %arg0, %c0_i32, %c0_i32_0 : i32, i32, i32
  }
}

</mosaic_0001>

<bundles_post_ra>
// kernel: tpu_custom_call.1
= control target key start
LH: loop header
LB: loop body
LE: loop exit
PB: predicated region body
PF: predicated region fallthrough
CT: control target
= control target key end

     0   :  { %vm13_vm0 = vcmask 261120   ;;  %s157_s0 = inlined_call_operand.vmem [shape: f32[8,32], index: 0, kind: input, shape index: {}]   ;;  %s158_s1 = inlined_call_operand.vmem [shape: s32[8,1], index: 1, kind: input, shape index: {}]   ;;  %s159_s2 = inlined_call_operand.hbm [shape: f32[1,8,128], index: 2, kind: output, shape index: {}]  }
   0x1   :  { %v12_v0 = vld [vmem:[%s157_s0] sm:$0xff] }
   0x2   :  { %7 = vsyncpa [#allocation3], 0  ;;  %v14_v1 = vsel %vm13_vm0, %v12_v0, -inf  ;;  %v118_v2 = vmov 0   ;;  %v27_v3 = vld [vmem:[%s158_s1] sm:$0xff]  ;;  %v25_v6 = vlaneseq  ;;  %v119_v10 = vmov 0.0  }
   0x3   :  { %87 = vset.pattern.permute.xlu0 %v118_v2  ;;  %vm54_vm2 = vcmask 7168   ;;  %s120_s0 = smov [#allocation2]  }
   0x4   :  { %15 = vmax.xlane.f32.xlu0 %v14_v1  ;;  %v26_v8 = vand.u32 127, %v25_v6  ;;  %s73_s1 = sshll.u32 %s120_s0, 4  ;;  %s74_s1 = int_to_ptr.vmem [resolvable:$true] %s73_s1 }
   0x5   :  { %s94_s14 = scalar_lea.vmem %s74_s1, 128  ;;  %p99_p1 = scmp.lt.s32.totalorder %s74_s1, %s74_s1 }
   0x6   :  { %p95_p0 = scmp.ne.s32.totalorder %s74_s1, %s94_s14  ;;  %p100_p2 = scmp.lt.s32.totalorder %s94_s14, %s94_s14 }
   0x8   :  { %p101_p3 = por %p100_p2, %p99_p1 }
   0xa   :  { %p102_p4 = pnand %p101_p3, %p95_p0 }
  0x1a   :  { %29 = vperm.xlu0 %87, %v27_v3  }
  0x91   :  { %v16_v4 = vpop.xlane.xlu0 %15 }
  0x92   :  { %v17_v5 = vsub.f32 %v12_v0, %v16_v4 }
  0x94   :  { %v18_v7 = vmul.f32 1.442695, %v17_v5 }
  0x96   :  { %88 = vpow2.f32 %v18_v7 }
  0x99   :  { %v30_v9 = vpop.permute.xlu0 %29 }
  0x9a   :  { %vm31_vm1 = vcmp.eq.s32.totalorder %v26_v8, %v30_v9 }
  0x9b   :  { %v81_v11 = vsel %vm31_vm1, 1.0, %v119_v10 }
  0x9c   :  { %v34_v14 = vmul.f32 %v81_v11, %v17_v5 }
  0x9e   :  { %v35_v15 = vsel %vm13_vm0, %v34_v14, 0.0 }
  0xa0   :  { %v89_v12 = vpop.eup %88 }
  0xa1   :  { %v20_v13 = vsel %vm13_vm0, %v89_v12, 0.0 }
  0xa2   :  { %21 = vadd.xlane.f32.xlu1 %v20_v13 }
  0xa6   :  { %36 = vadd.xlane.f32.xlu1 %v35_v15 }
 0x12f   :  { %v22_v16 = vpop.xlane.xlu1 %21 }
 0x130   :  { %90 = vlog2.f32 %v22_v16 }
 0x133   :  { %v37_v19 = vpop.xlane.xlu1 %36 }
 0x13a   :  { %v91_v17 = vpop.eup %90 }
 0x13b   :  { %v24_v18 = vmul.f32 0.6931472, %v91_v17 }
 0x13d   :  { %v38_v20 = vsub.f32 %v37_v19, %v24_v18 }
 0x13f   :  { %v39_v21 = vmul.f32 1.442695, %v38_v20 }
 0x141   :  { %92 = vpow2.f32 %v39_v21 }
 0x14b   :  { %v93_v22 = vpop.eup %92 }
 0x14c   :  { %v41_v23 = vsub.f32 1.0, %v93_v22 }
 0x14e   :  { %v42_v24 = vmul.f32 %v41_v23, %v41_v23 }
 0x150   :  { %v43_v25 = vmul.f32 %v42_v24, %v42_v24 }
 0x152   :  { %v44_v26 = vmul.f32 %v43_v25, %v41_v23 }
 0x154   :  { %v45_v27 = vmul.f32 %v44_v26, %v38_v20 }
 0x156   :  { %v46_v28 = vsub.f32 0.0, %v45_v27 }
 0x158   :  { %v55_v29 = vsel %vm54_vm2, %v46_v28, 0.0 }
 0x159   :  { %56 = vadd.xlane.f32.xlu1 %v55_v29 }
 0x1e6   :  { %v57_v30 = vpop.xlane.xlu1 %56 }
 0x1e7   :  { %v58_v31 = vrot.slane %v57_v30, 4 }
 0x1e9   :  { %v59_v32 = vadd.f32 %v58_v31, %v57_v30 }
 0x1eb   :  { %v60_v33 = vrot.slane %v59_v32, 2 }
 0x1ed   :  { %v61_v34 = vadd.f32 %v60_v33, %v59_v32 }
 0x1ef   :  { %v62_v35 = vrot.slane %v61_v34, 1 }
 0x1f1   :  { %v63_v36 = vadd.f32 %v62_v35, %v61_v34 }
 0x1f3   :  { %82 = vpush %v63_v36 }
 0x224   :  { %s83_s13 = spop %82 }
 0x225   :  { %v65_v37 = vstv %s83_s13 }
 0x226   :  { %66 = vst [vmem:[#allocation2] sm:$0xff] %v65_v37 }
 0x227   :  { %105 = shalt.err (!%p102_p4)
}
 0x228   :  { %s106_s17 = scalar_lea.hbm %s159_s2, 128 }
 0x229   :  { %p107_p5 = scmp.ne.s32.totalorder %s159_s2, %s106_s17  ;;  %p110_p6 = scmp.lt.u32.totalorder %s106_s17, %s159_s2 }
 0x22b   :  { %p112_p7 = pnand %p110_p6, %p107_p5 }
 0x22d   :  { %115 = shalt.err (!%p112_p7)
}
 0x22e   :  { %76 = dma.vmem_to_hbm [thread:$0]  %s74_s1, 128, %s159_s2, [#allocation3]  }
 0x22f   :  { %116 = dma.done.wait [#allocation3], 128  }
 0x230   :  { %117 = vsyncadd [#allocation3], 4294967168 }
 0x231   :  { %80 = vsyncpa [#allocation3], 1 }

</bundles_post_ra>
